<compile_context>
chip_gen: v6e
topology: v6e:2x2x1
jax: 0.10.0
libtpu: 0.0.40
codegen_flags: <defaults>
</compile_context>

<pallas_src>
import functools
import math

import jax
import jax.numpy as jnp
from jax import lax
from jax.experimental import pallas as pl
from jax.experimental.pallas import tpu as pltpu


# --------------------------------------------------------------------------
# helpers
# --------------------------------------------------------------------------
def _pick_tile(n, target):
    """Largest multiple of 128 that divides n and is <= target (else n)."""
    if n % 128 != 0:
        return n
    t = max(min(target, n), 128)
    t = (t // 128) * 128
    while t > 128 and n % t != 0:
        t -= 128
    return t if n % t == 0 else n


def _pick_group(n, target):
    """Largest divisor of n that is <= target."""
    g = max(min(target, n), 1)
    while n % g != 0:
        g -= 1
    return g


def _compiler_params(num_axes, vmem_bytes=None):
    return pltpu.CompilerParams(
        dimension_semantics=("parallel",) * num_axes,
        vmem_limit_bytes=vmem_bytes)


# --------------------------------------------------------------------------
# 1x1 convolution (pointwise projection) kernel: y[b,o,n] = W[o,c] x[b,c,n]+b
# --------------------------------------------------------------------------
def _pointwise_proj_kernel(x_ref, w_ref, b_ref, y_ref):
    # x: (1, Cin, TN), w: (Cout, Cin), b: (Cout, 1)
    y = jnp.dot(w_ref[...], x_ref[0], preferred_element_type=jnp.float32)
    y_ref[0] = (y + b_ref[...]).astype(y_ref.dtype)


def pointwise_projection(x, w, b, *, tile_n=512):
    B, Cin, N = x.shape
    Cout = w.shape[0]
    tn = _pick_tile(N, tile_n)
    b2 = b.reshape(Cout, 1)
    return pl.pallas_call(
        _pointwise_proj_kernel,
        out_shape=jax.ShapeDtypeStruct((B, Cout, N), x.dtype),
        grid_spec=pltpu.PrefetchScalarGridSpec(
            num_scalar_prefetch=0,
            grid=(B, N // tn),
            in_specs=[
                pl.BlockSpec((1, Cin, tn), lambda i, j: (i, 0, j)),
                pl.BlockSpec((Cout, Cin), lambda i, j: (0, 0)),
                pl.BlockSpec((Cout, 1), lambda i, j: (0, 0)),
            ],
            out_specs=pl.BlockSpec((1, Cout, tn), lambda i, j: (i, 0, j)),
        ),
        compiler_params=_compiler_params(2),
    )(x, w, b2)


# --------------------------------------------------------------------------
# multi-head attention core (NCH, heads already split to the leading axis)
# --------------------------------------------------------------------------
def _mha_nch_kernel(q_ref, k_ref, v_ref, o_ref, *, scale):
    # q: (G, Dq, TQ), k: (G, Dq, Nk), v: (G, Dv, Nk); G = batch*head slices.
    q = q_ref[...] * scale            # scale q (Dq*TQ elems, not Nk*TQ)
    k = k_ref[...]
    v = v_ref[...]

    # scores (G, Nk, TQ) = K^T Q: contract head-dim of both operands directly
    # (no explicit .T / vreg relayout before the MXU push).
    s = lax.dot_general(
        k, q, dimension_numbers=(((1,), (1,)), ((0,), (0,))),
        preferred_element_type=jnp.float32)

    # softmax over the key axis (axis=1 == torch dim=4 of (B,1,H,Nq,Nk))
    s_max = jnp.max(s, axis=1, keepdims=True)
    e = jnp.exp(s - s_max)
    w = e * pl.reciprocal(jnp.sum(e, axis=1, keepdims=True), approx=True)

    # out (G, Dv, TQ) = V @ weights
    o = lax.dot_general(
        v, w.astype(v.dtype),
        dimension_numbers=(((2,), (1,)), ((0,), (0,))),
        preferred_element_type=jnp.float32)
    o_ref[...] = o.astype(o_ref.dtype)


def _mha_working_set(g, tq, dq, dv, nk):
    blocks = 4 * g * (dq * tq + dq * nk + dv * nk + dv * tq)  # f32 I/O blocks
    scores = 4 * g * nk * tq                                  # in-kernel S / E
    return 2 * blocks + 2 * scores                            # double-buffered


def mha_core_nch(q, k, v, *, scale, tile_q=512, bh_block=8):
    """q: (BH, Dq, Nq), k: (BH, Dq, Nk), v: (BH, Dv, Nk) -> (BH, Dv, Nq)."""
    BH, Dq, Nq = q.shape
    Dv = v.shape[1]
    Nk = k.shape[2]

    tq = _pick_tile(Nq, tile_q)
    g = _pick_group(BH, bh_block)

    # Size tiles against a conservative 24 MiB working-set budget so the same
    # kernel fits v7x's 64 MiB VMEM (v5e/v6e have 128 MiB).
    budget = 24 << 20
    while g > 1 and _mha_working_set(g, tq, Dq, Dv, Nk) > budget:
        g = _pick_group(BH, g - 1)
    while (Nq % 128 == 0 and tq > 128
           and _mha_working_set(g, tq, Dq, Dv, Nk) > budget):
        tq = _pick_tile(Nq, tq - 128)

    vmem_bytes = int(min(max(_mha_working_set(g, tq, Dq, Dv, Nk) + (4 << 20),
                             16 << 20), 48 << 20))

    kernel = functools.partial(_mha_nch_kernel, scale=scale)
    return pl.pallas_call(
        kernel,
        out_shape=jax.ShapeDtypeStruct((BH, Dv, Nq), q.dtype),
        grid_spec=pltpu.PrefetchScalarGridSpec(
            num_scalar_prefetch=0,
            grid=(BH // g, Nq // tq),
            in_specs=[
                pl.BlockSpec((g, Dq, tq), lambda i, j: (i, 0, j)),
                # k/v are constant along j -> stay VMEM-resident across tiles
                pl.BlockSpec((g, Dq, Nk), lambda i, j: (i, 0, 0)),
                pl.BlockSpec((g, Dv, Nk), lambda i, j: (i, 0, 0)),
            ],
            out_specs=pl.BlockSpec((g, Dv, tq), lambda i, j: (i, 0, j)),
        ),
        compiler_params=_compiler_params(2, vmem_bytes),
    )(q, k, v)


# --------------------------------------------------------------------------
# LayerNorm over the channel axis of an NCH tensor (+ fused residual / relu)
# --------------------------------------------------------------------------
def _ln_body(x, g_ref, b_ref, y_ref, eps):
    mean = jnp.mean(x, axis=0, keepdims=True)
    xc = x - mean
    var = jnp.mean(xc * xc, axis=0, keepdims=True)
    inv = lax.rsqrt(var + eps)
    y_ref[0] = (xc * inv * g_ref[...] + b_ref[...]).astype(y_ref.dtype)


def _ln_channels_kernel(x_ref, g_ref, b_ref, y_ref, *, eps, add_relu):
    x = x_ref[0].astype(jnp.float32)              # (C, TN)
    if add_relu:                                  # fused o = o + relu(o)
        x = x + jnp.maximum(x, 0.0)
    _ln_body(x, g_ref, b_ref, y_ref, eps)


def _add_ln_channels_kernel(x_ref, r_ref, g_ref, b_ref, y_ref, *, eps):
    x = x_ref[0].astype(jnp.float32) + r_ref[0].astype(jnp.float32)
    _ln_body(x, g_ref, b_ref, y_ref, eps)


def layernorm_channels(x, gamma, beta, *, eps=1e-5, residual=None,
                       pre_relu_residual=False, tile_n=512):
    B, C, N = x.shape
    tn = _pick_tile(N, tile_n)
    g2 = gamma.reshape(C, 1)
    b2 = beta.reshape(C, 1)
    x_spec = pl.BlockSpec((1, C, tn), lambda i, j: (i, 0, j))
    p_spec = pl.BlockSpec((C, 1), lambda i, j: (0, 0))

    if residual is not None:
        kernel = functools.partial(_add_ln_channels_kernel, eps=eps)
        in_specs = [x_spec, x_spec, p_spec, p_spec]
        args = (x, residual, g2, b2)
    else:
        kernel = functools.partial(_ln_channels_kernel, eps=eps,
                                   add_relu=pre_relu_residual)
        in_specs = [x_spec, p_spec, p_spec]
        args = (x, g2, b2)

    return pl.pallas_call(
        kernel,
        out_shape=jax.ShapeDtypeStruct((B, C, N), x.dtype),
        grid_spec=pltpu.PrefetchScalarGridSpec(
            num_scalar_prefetch=0,
            grid=(B, N // tn),
            in_specs=in_specs,
            out_specs=x_spec,
        ),
        compiler_params=_compiler_params(2),
    )(*args)


# --------------------------------------------------------------------------
# full MultiheadAttentionBlock forward (NCH)
# --------------------------------------------------------------------------
def multihead_attention_block_nch(Q, K, V, params, *, num_heads, eps=1e-5):
    if K is None:
        K = Q
    if V is None:
        V = K
    B, C, Nq = Q.shape
    H = num_heads
    dq = params['wq'].shape[0] // H
    dv = params['wv'].shape[0] // H
    scale = 1.0 / math.sqrt(C)          # module: 1/sqrt(num_dim_q)

    # 1x1-conv projections
    q = pointwise_projection(Q, params['wq'], params['bq'])
    k = pointwise_projection(K, params['wk'], params['bk'])
    v = pointwise_projection(V, params['wv'], params['bv'])

    # split heads: torch .view maps channel c -> (d, h) = (c // H, c % H)
    def to_heads(x, d):
        b, _, n = x.shape
        x = x.reshape(b, d, H, n)
        x = jnp.transpose(x, (0, 2, 1, 3))
        return x.reshape(b * H, d, n)

    qh = to_heads(q, dq)
    kh = to_heads(k, dq)
    vh = to_heads(v, dv)

    oh = mha_core_nch(qh, kh, vh, scale=scale)          # (B*H, dv, Nq)

    o = oh.reshape(B, H, dv, Nq)
    o = jnp.transpose(o, (0, 2, 1, 3)).reshape(B, dv * H, Nq)

    o = pointwise_projection(o, params['wo'], params['bo'])

    # o = LN0(Q + o)   (LayerNorm over channels, torch transposes first)
    o = layernorm_channels(o, params['g0'], params['b0'], eps=eps, residual=Q)
    # o = LN1(o + relu(o))
    # TODO(synk): the reference uses an in-place ReLU (`o + act(o)`), which in
    # PyTorch aliases to 2*relu(o); we implement the non-inplace intent
    # `o + relu(o)` here.
    o = layernorm_channels(o, params['g1'], params['b1'], eps=eps,
                           pre_relu_residual=True)
    return o


# --------------------------------------------------------------------------
# pure-JAX reference (same math, no Pallas)
# --------------------------------------------------------------------------
def _reference_block(Q, K, V, params, *, num_heads, eps=1e-5):
    if K is None:
        K = Q
    if V is None:
        V = K
    B, C, Nq = Q.shape
    H = num_heads
    scale = 1.0 / math.sqrt(C)

    def proj(x, w, b):
        return jnp.einsum('oc,bcn->bon', w, x) + b[None, :, None]

    q = proj(Q, params['wq'], params['bq'])
    k = proj(K, params['wk'], params['bk'])
    v = proj(V, params['wv'], params['bv'])
    dq = q.shape[1] // H
    dv = v.shape[1] // H
    Nk = k.shape[2]
    qh = q.reshape(B, dq, H, Nq)
    kh = k.reshape(B, dq, H, Nk)
    vh = v.reshape(B, dv, H, Nk)
    s = jnp.einsum('bdhi,bdhj->bhij', qh, kh) * scale
    att = jax.nn.softmax(s, axis=-1)
    oh = jnp.einsum('bhij,bdhj->bdhi', att, vh)
    o = oh.reshape(B, dv * H, Nq)
    o = proj(o, params['wo'], params['bo'])

    def ln(x, g, b):
        m = jnp.mean(x, axis=1, keepdims=True)
        var = jnp.mean((x - m) ** 2, axis=1, keepdims=True)
        return ((x - m) / jnp.sqrt(var + eps) * g[None, :, None]
                + b[None, :, None])

    o = ln(Q + o, params['g0'], params['b0'])
    o = o + jax.nn.relu(o)
    o = ln(o, params['g1'], params['b1'])
    return o


if __name__ == "__main__":
    # Small deterministic test: batch=2, channels=64, points=128, heads=4.
    B, C, N, H = 2, 64, 128, 4
    dq = dv = C // H

    key = jax.random.PRNGKey(0)
    keys = jax.random.split(key, 11)

    def init(k, shape, s=0.1):
        return s * jax.random.normal(k, shape, dtype=jnp.float32)

    params = {
        'wq': init(keys[0], (dq * H, C)), 'bq': init(keys[1], (dq * H,)),
        'wk': init(keys[2], (dq * H, C)), 'bk': init(keys[3], (dq * H,)),
        'wv': init(keys[4], (dv * H, C)), 'bv': init(keys[5], (dv * H,)),
        'wo': init(keys[6], (C, dv * H)), 'bo': init(keys[7], (C,)),
        'g0': jnp.ones((C,), jnp.float32), 'b0': jnp.zeros((C,), jnp.float32),
        'g1': jnp.ones((C,), jnp.float32), 'b1': jnp.zeros((C,), jnp.float32),
    }

    Q = jax.random.normal(keys[8], (B, C, N), dtype=jnp.float32)
    K = jax.random.normal(keys[9], (B, C, N), dtype=jnp.float32)
    V = jax.random.normal(keys[10], (B, C, N), dtype=jnp.float32)

    out = multihead_attention_block_nch(Q, K, V, params, num_heads=H)
    jax.block_until_ready(out)

    ref = _reference_block(Q, K, V, params, num_heads=H)
    err = float(jnp.max(jnp.abs(out - ref)))
    assert out.shape == (B, C, N)
    assert jnp.allclose(out, ref, atol=2e-3, rtol=2e-3), f"max abs err {err}"

    print("KERNEL_OK")
</pallas_src>

<mosaic_0001>
module attributes {stable_mosaic.version = 11 : i64} {
  func.func @_pointwise_proj_kernel(%arg0: i32, %arg1: i32, %arg2: memref<1x64x128xf32, #tpu.memory_space<vmem>>, %arg3: memref<64x64xf32, #tpu.memory_space<vmem>>, %arg4: memref<64x1xf32, #tpu.memory_space<vmem>>, %arg5: memref<1x64x128xf32, #tpu.memory_space<vmem>>) attributes {dimension_semantics = [#tpu.dimension_semantics<parallel>, #tpu.dimension_semantics<parallel>], iteration_bounds = array<i64: 2, 1>, scalar_prefetch = 0 : i64, scratch_operands = 0 : i64, tpu.core_type = #tpu.core_type<tc>, window_params = [{transform_indices = @transform_0, window_bounds = array<i64: 1, 64, 128>}, {pipeline_mode = #tpu.pipeline_mode<synchronous>, transform_indices = @transform_1, window_bounds = array<i64: 64, 64>}, {pipeline_mode = #tpu.pipeline_mode<synchronous>, transform_indices = @transform_2, window_bounds = array<i64: 64, 1>}, {transform_indices = @transform_3, window_bounds = array<i64: 1, 64, 128>}]} {
    %c0 = arith.constant 0 : index
    %c0_0 = arith.constant 0 : index
    %0 = vector.load %arg3[%c0, %c0_0] : memref<64x64xf32, #tpu.memory_space<vmem>>, vector<64x64xf32>
    %c0_1 = arith.constant 0 : index
    %c0_2 = arith.constant 0 : index
    %c0_3 = arith.constant 0 : index
    %1 = vector.load %arg2[%c0_1, %c0_2, %c0_3] : memref<1x64x128xf32, #tpu.memory_space<vmem>>, vector<1x64x128xf32>
    %2 = vector.shape_cast %1 : vector<1x64x128xf32> to vector<64x128xf32>
    %cst = arith.constant dense<0.000000e+00> : vector<64x128xf32>
    %3 = tpu.matmul %0, %2, %cst {dimension_numbers = #tpu.dot_dimension_numbers<[1], [0], [0], [1], [0, 0, 1, 1], [], []>} : vector<64x64xf32>, vector<64x128xf32>, vector<64x128xf32> -> vector<64x128xf32>
    %c0_4 = arith.constant 0 : index
    %c0_5 = arith.constant 0 : index
    %4 = vector.load %arg4[%c0_4, %c0_5] : memref<64x1xf32, #tpu.memory_space<vmem>>, vector<64x1xf32>
    %5 = vector.broadcast %4 : vector<64x1xf32> to vector<64x128xf32>
    %6 = arith.addf %3, %5 : vector<64x128xf32>
    %c0_6 = arith.constant 0 : index
    %c0_7 = arith.constant 0 : index
    %c0_8 = arith.constant 0 : index
    %7 = vector.load %arg5[%c0_6, %c0_7, %c0_8] : memref<1x64x128xf32, #tpu.memory_space<vmem>>, vector<1x64x128xf32>
    %8 = vector.shape_cast %7 : vector<1x64x128xf32> to vector<64x128xf32>
    %9 = vector.shape_cast %6 : vector<64x128xf32> to vector<1x64x128xf32>
    tpu.vector_store %arg5[%c0_6, %c0_7, %c0_8], %9 {strides = array<i32>} : memref<1x64x128xf32, #tpu.memory_space<vmem>>, vector<1x64x128xf32>,
    return
  }
  func.func @transform_0(%arg0: i32, %arg1: i32) -> (i32, i32, i32) {
    %c0_i32 = arith.constant 0 : i32
    %c0_i32_0 = arith.constant 0 : i32
    return %arg0, %c0_i32, %arg1 : i32, i32, i32
  }
  func.func @transform_1(%arg0: i32, %arg1: i32) -> (i32, i32) {
    %c0_i32 = arith.constant 0 : i32
    %c0_i32_0 = arith.constant 0 : i32
    %c0_i32_1 = arith.constant 0 : i32
    return %c0_i32, %c0_i32_0 : i32, i32
  }
  func.func @transform_2(%arg0: i32, %arg1: i32) -> (i32, i32) {
    %c0_i32 = arith.constant 0 : i32
    %c0_i32_0 = arith.constant 0 : i32
    %c0_i32_1 = arith.constant 0 : i32
    return %c0_i32, %c0_i32_0 : i32, i32
  }
  func.func @transform_3(%arg0: i32, %arg1: i32) -> (i32, i32, i32) {
    %c0_i32 = arith.constant 0 : i32
    %c0_i32_0 = arith.constant 0 : i32
    return %arg0, %c0_i32, %arg1 : i32, i32, i32
  }
}

</mosaic_0001>

<bundles_post_ra>
// kernel: tpu_custom_call.1
= control target key start
LH: loop header
LB: loop body
LE: loop exit
PB: predicated region body
PF: predicated region fallthrough
CT: control target
= control target key end

     0   :  { %8 = vsyncpa [#allocation3], 0  ;;  %s1015_s0 = inlined_call_operand.hbm [shape: f32[2,64,128], index: 0, kind: input, shape index: {}]   ;;  %s1016_s1 = inlined_call_operand.vmem [shape: f32[64,64], index: 1, kind: input, shape index: {}]   ;;  %s1017_s2 = inlined_call_operand.vmem [shape: f32[64,1], index: 2, kind: input, shape index: {}]   ;;  %s1018_s3 = inlined_call_operand.hbm [shape: f32[2,64,128], index: 3, kind: output, shape index: {}]  }
   0x1   :  { %10 = vsyncpa [#allocation3 + $0x1], 0 }
   0x2   :  { %11 = vsyncpa [#allocation4], 0 }
   0x3   :  { %13 = vsyncpa [#allocation4 + $0x1], 0  ;;  %s799_s12 = smov 0   ;;  %s801_s13 = smov 0  }
   0x4   :  { %s803_s14 = smov 0   ;;  %s805_s15 = smov 0  }
   0x5   :  { %s807_s16 = smov 0   ;;  %s809_s17 = smov 0  }
   0x6 LB: > { %s508_s18 = sadd.s32 4294967295, %s770_s17   ;;  %s509_s19 = sadd.s32 4294967294, %s770_s17   ;;  %s770_s17 = sphi %s809_s17, %s19_s17   ;;  %s766_s16 = sphi %s807_s16, %s1029_s16   ;;  %s762_s15 = sphi %s805_s15, %s1028_s15   ;;  %s758_s14 = sphi %s803_s14, %s1027_s14   ;;  %s754_s13 = sphi %s801_s13, %s1026_s13   ;;  %s750_s12 = sphi %s799_s12, %s1025_s12  }
   0x7   : > { %s31_s20 = sadd.s32 1, %s766_s16  ;;  %s40_s21 = sadd.s32 1, %s758_s14 }
   0x8   : > { %p33_p0 = scmp.ge.s32.totalorder %s31_s20, 2  ;;  %p47_p1 = scmp.ne.s32.totalorder %s758_s14, %s754_s13 }
   0x9   : > { %p48_p2 = scmp.eq.s32.totalorder %s770_s17, 0  ;;  %p53_p3 = scmp.ne.s32.totalorder %s754_s13, %s750_s12 }
   0xa   : > { %s1031_s20 = smov (%p33_p0, %s31_s20), 0  ;;  %p54_p5 = scmp.eq.s32.totalorder %s508_s18, 0 }
   0xb   : > { %p840_p4 = por %p48_p2, %p47_p1  ;;  %s35_s23 = ssub.s32 %s766_s16, %s1031_s20 }
   0xc   : > { %p121_p6 = scmp.eq.s32.totalorder %s508_s18, 1  ;;  %p38_p7 = scmp.eq.s32.totalorder %s35_s23, 0 }
   0xd   : > { %p846_p8 = por %p54_p5, %p53_p3  ;;  %p127_p10 = scmp.eq.s32.totalorder %s509_s19, 1 }
   0xe   : > { %p850_p9 = por %p121_p6, %p47_p1  ;;  %p605_p13 = scmp.lt.s32.totalorder %s770_s17, 2 }
   0xf   : > { %s855_s26 = scalar_select %p38_p7, %s758_s14, %s40_s21  }
  0x10   : > { %p857_p11 = por %p127_p10, %p53_p3  ;;  %s153_s28 = sand.u32 1, %s758_s14  }
  0x11   : > { %s512_s29 = sshll.u32 %s153_s28, 6  ;;  %s531_s30 = sshll.u32 %s766_s16, 10 }
  0x12   : > { %s164_s6 = scalar_lea.hbm %s1015_s0, %s531_s30  ;;  %s157_s7 = scalar_lea.vmem [#allocation2], %s512_s29 }
  0x13   : > { %s165_s8 = sshll.u32 %s157_s7, 4  ;;  %p870_p0 = pnand %p605_p13, %p840_p4  ;;  %s166_s8 = int_to_ptr.vmem [resolvable:$true] %s165_s8 }
  0x14   : > { %p515_p1 = scmp.ge.s32.totalorder %s770_s17, 1  ;;  %s154_s10 = scalar_lea.sflag [#allocation3], %s153_s28 }
  0x15   : > { %p664_p2 = pneg %p870_p0  ;;  %s675_s11 = scalar_lea.vmem %s166_s8, 1024 }
  0x16   : > { %p676_p3 = scmp.ne.s32.totalorder %s166_s8, %s675_s11  ;;  %s772_s18 = smov [#allocation2]  }
  0x17   : > { %s680_s19 = sshll.u32 %s772_s18, 4  ;;  %s681_s19 = int_to_ptr.vmem [resolvable:$false] %s680_s19 }
  0x18   : > { %p678_p5 = pnand %p676_p3, %p664_p2  ;;  %s682_s21 = scalar_lea.vmem %s681_s19, 2048 }
  0x19   : > { %p683_p7 = scmp.lt.s32.totalorder %s166_s8, %s681_s19  ;;  %p684_p10 = scmp.lt.s32.totalorder %s682_s21, %s675_s11 }
  0x1a   : > { %p679_p6 = pneg %p678_p5 }
  0x1b   : > { %p685_p12 = por %p684_p10, %p683_p7 }
  0x1d   : > { %p686_p4 = pnand %p685_p12, %p679_p6 }
  0x1f   : > { %689 = shalt.err (!%p686_p4)
}
  0x20   : > { %s773_s22 = smov 128   ;;  %s774_s23 = smov 8  }
  0x21   : > { %600 = dma.hbm_to_vmem [thread:$0]  (!%p870_p0), %s164_s6, 1024, %s166_s8, %s154_s10, %s773_s22, %s773_s22, %s774_s23  }
  0x22   : > { %p173_p13 = scmp.lt.s32.totalorder %s770_s17, 3 }
  0x24   : > { %p174_p2 = pnand %p515_p1, %p173_p13 }
  0x25   : > { %s883_s28 = sand.u32 (!%p174_p2), 1, %s754_s13  }
  0x26   : > { %177 = sbr.rel (%p174_p2) target bundleno = 278 (0x116), region = 32  ;;  %s516_s29 = sshll.u32 (!%p174_p2), %s883_s28, 6 }
  0x27   : > { %s180_s30 = scalar_lea.sflag (!%p174_p2), [#allocation3], %s883_s28  ;;  %s889_s4 = scalar_lea.vmem (!%p174_p2), [#allocation2], %s516_s29 }
  0x2b   : > { %741 = dma.done.wait (%p846_p8), %s180_s30, 1024  }
  0x2c   : > { %743 = vsyncadd (%p846_p8), %s180_s30, 4294966272  ;;  %v775_v0 = vmov 0   ;;  %v221_v1 = vld [vmem:[%s889_s4 + $0x38] sm:$0xff]  ;;  %v220_v2 = vld [vmem:[%s889_s4 + $0x30] sm:$0xff]  ;;  %vm270_vm0 = vcmask 523264   ;;  %s205_s6 = scalar_lea.vmem [#allocation5], %s516_s29 }
  0x2d   : > { %661 = vset.pattern.permute.xlu1 %v775_v0  ;;  %660 = vset.pattern.permute.xlu0 %v775_v0  ;;  %v219_v3 = vld [vmem:[%s889_s4 + $0x28] sm:$0xff]  ;;  %v218_v4 = vld [vmem:[%s889_s4 + $0x20] sm:$0xff]  ;;  %v217_v5 = vld [vmem:[%s889_s4 + $0x18] sm:$0xff]  ;;  %s423_s7 = sshll.u32 %s205_s6, 4  ;;  %s532_s8 = sshll.u32 %s762_s15, 10  ;;  %s962_s7 = int_to_ptr.vmem [resolvable:$true] %s423_s7 }
  0x2e   : > { %549 = vmatprep.subr.mxu0 %v221_v1  ;;  %577 = vmatprep.subr.mxu1 %v221_v1  ;;  %v216_v6 = vld [vmem:[%s889_s4 + $0x10] sm:$0xff]  ;;  %v215_v7 = vld [vmem:[%s889_s4 + $0x8] sm:$0xff]  ;;  %v214_v8 = vld [vmem:[%s889_s4] sm:$0xff]  ;;  %s967_s10 = scalar_lea.hbm %s1018_s3, %s532_s8  ;;  %s409_s15 = scalar_lea.sflag [#allocation4], %s883_s28 }
  0x2f   : > { %550 = vmatpush3.msra.mxu0 %v221_v1  ;;  %585 = vmatpush3.msra.mxu1 %v221_v1  ;;  %v206_v9 = vld [vmem:[%s1016_s1] sm:$0xff]  ;;  %v207_v11 = vld [vmem:[%s1016_s1 + $0x8] sm:$0xff]  ;;  %v208_v13 = vld [vmem:[%s1016_s1 + $0x10] sm:$0xff]  ;;  %s690_s11 = scalar_lea.vmem %s962_s7, 1024  ;;  %s776_s18 = smov [#allocation5]  }
  0x30   : > { %551 = vmatprep.subr.mxu0 %v220_v2  ;;  %578 = vmatprep.subr.mxu1 %v220_v2  ;;  %v210_v10 = vld [vmem:[%s1016_s1 + $0x20] sm:$0xff]  ;;  %v211_v12 = vld [vmem:[%s1016_s1 + $0x28] sm:$0xff]  ;;  %v212_v14 = vld [vmem:[%s1016_s1 + $0x30] sm:$0xff]  ;;  %p691_p8 = scmp.ne.s32.totalorder %s962_s7, %s690_s11  ;;  %s694_s19 = sshll.u32 %s776_s18, 4  ;;  %s695_s19 = int_to_ptr.vmem [resolvable:$false] %s694_s19 }
  0x31   : > { %552 = vmatpush3.msra.mxu0 %v220_v2  ;;  %586 = vmatpush3.msra.mxu1 %v220_v2  ;;  %v224_v15 = vld [vmem:[%s1017_s2 + $0x10] sm:$0xff]  ;;  %v222_v16 = vld [vmem:[%s1017_s2] sm:$0xff]  ;;  %v209_v17 = vld [vmem:[%s1016_s1 + $0x18] sm:$0xff]  ;;  %s696_s21 = scalar_lea.vmem %s695_s19, 2048  ;;  %p697_p1 = scmp.lt.s32.totalorder %s962_s7, %s695_s19 }
  0x32   : > { %553 = vmatprep.subr.mxu0 %v219_v3  ;;  %579 = vmatprep.subr.mxu1 %v219_v3  ;;  %v213_v18 = vld [vmem:[%s1016_s1 + $0x38] sm:$0xff]  ;;  %v223_v20 = vld [vmem:[%s1017_s2 + $0x8] sm:$0xff]  ;;  %v226_v22 = vld [vmem:[%s1017_s2 + $0x20] sm:$0xff]  ;;  %p692_p12 = pnand %p691_p8, %p850_p9  ;;  %p698_p3 = scmp.lt.s32.totalorder %s696_s21, %s690_s11 }
  0x33   : > { %554 = vmatpush3.msra.mxu0 %v219_v3  ;;  %587 = vmatpush3.msra.mxu1 %v219_v3  ;;  %v225_v19 = vld [vmem:[%s1017_s2 + $0x18] sm:$0xff]  ;;  %v227_v21 = vld [vmem:[%s1017_s2 + $0x28] sm:$0xff]  ;;  %v228_v24 = vld [vmem:[%s1017_s2 + $0x30] sm:$0xff] }
  0x34   : > { %555 = vmatprep.subr.mxu0 %v218_v4  ;;  %580 = vmatprep.subr.mxu1 %v218_v4  ;;  %v229_v23 = vld [vmem:[%s1017_s2 + $0x38] sm:$0xff]  ;;  %p693_p0 = pneg %p692_p12  ;;  %p699_p5 = por %p698_p3, %p697_p1 }
  0x35   : > { %556 = vmatpush3.msra.mxu0 %v218_v4  ;;  %588 = vmatpush3.msra.mxu1 %v218_v4 }
  0x36   : > { %557 = vmatprep.subr.mxu0 %v217_v5  ;;  %581 = vmatprep.subr.mxu1 %v217_v5  ;;  %p700_p6 = pnand %p699_p5, %p693_p0 }
  0x37   : > { %558 = vmatpush3.msra.mxu0 %v217_v5  ;;  %589 = vmatpush3.msra.mxu1 %v217_v5 }
  0x38   : > { %559 = vmatprep.subr.mxu0 %v216_v6  ;;  %582 = vmatprep.subr.mxu1 %v216_v6 }
  0x39   : > { %560 = vmatpush3.msra.mxu0 %v216_v6  ;;  %590 = vmatpush3.msra.mxu1 %v216_v6 }
  0x3a   : > { %561 = vmatprep.subr.mxu0 %v215_v7  ;;  %583 = vmatprep.subr.mxu1 %v215_v7 }
  0x3b   : > { %562 = vmatpush3.msra.mxu0 %v215_v7  ;;  %591 = vmatpush3.msra.mxu1 %v215_v7 }
  0x3c   : > { %563 = vmatprep.subr.mxu0 %v214_v8  ;;  %584 = vmatprep.subr.mxu1 %v214_v8 }
  0x3d   : > { %564 = vmatpush3.msra.mxu0 %v214_v8  ;;  %592 = vmatpush3.msra.mxu1 %v214_v8 }
  0x3e   : > { %565 = vmatprep.mubr.msk.f32.mxu0 %vm270_vm0, %v206_v9  ;;  %571 = vmatprep.mubr.msk.f32.mxu1 %vm270_vm0, %v210_v10 }
  0x3f   : > { %566 = vmatmul.mubr.msk.f32.vlgmr.msra.gmra.mxu0 %vm270_vm0, %v207_v11  ;;  %572 = vmatmul.mubr.msk.f32.vlgmr.msra.gmra.mxu1 %vm270_vm0, %v211_v12 }
  0x40   : > { %568 = vmatprep.mubr.msk.f32.mxu0 %vm270_vm0, %v208_v13  ;;  %574 = vmatprep.mubr.msk.f32.mxu1 %vm270_vm0, %v212_v14 }
  0x41   : > { %242 = vperm.xlu1 %661, %v224_v15   ;;  %232 = vperm.xlu0 %660, %v222_v16  }
  0x43   : > { %569 = vmatmul.mubr.msk.f32.gmra.mxu0 %vm270_vm0, %v209_v17  ;;  %575 = vmatmul.mubr.msk.f32.gmra.mxu1 %vm270_vm0, %v213_v18 }
  0x45   : > { %247 = vperm.xlu1 %661, %v225_v19   ;;  %237 = vperm.xlu0 %660, %v223_v20  }
  0x49   : > { %257 = vperm.xlu1 %661, %v227_v21   ;;  %252 = vperm.xlu0 %660, %v226_v22  }
  0x4d   : > { %267 = vperm.xlu1 %661, %v229_v23   ;;  %262 = vperm.xlu0 %660, %v228_v24  }
  0xbc   : > { %v243_v25 = vpop.permute.xlu1 %242  ;;  %v233_v26 = vpop.permute.xlu0 %232 }
  0xc0   : > { %v248_v27 = vpop.permute.xlu1 %247  ;;  %v238_v28 = vpop.permute.xlu0 %237 }
  0xc4   : > { %v258_v29 = vpop.permute.xlu1 %257  ;;  %v253_v30 = vpop.permute.xlu0 %252 }
  0xc8   : > { %v268_v37 = vpop.permute.xlu1 %267  ;;  %v263_v42 = vpop.permute.xlu0 %262 }
  0xff   : > { %v567_v31 = vpop.f32.mrf.mxu0  ;;  %v573_v32 = vpop.f32.mrf.mxu1 }
 0x100   : > { %v367_v33 = vadd.f32 %v567_v31, %v238_v28  ;;  %v387_v34 = vadd.f32 %v573_v32, %v258_v29 }
 0x101   : > { %v361_v35 = vpop.f32.mrf.mxu0  ;;  %v381_v36 = vpop.f32.mrf.mxu1 }
 0x102   : > { %401 = vst [vmem:[%s205_s6 + $0x8] sm:$0xff] %v367_v33  ;;  %405 = vst [vmem:[%s205_s6 + $0x28] sm:$0xff] %v387_v34  ;;  %v362_v38 = vadd.f32 %v361_v35, %v233_v26  ;;  %v382_v39 = vadd.f32 %v381_v36, %v253_v30 }
 0x103   : > { %v570_v40 = vpop.f32.mrf.mxu0  ;;  %v576_v41 = vpop.f32.mrf.mxu1 }
 0x104   : > { %400 = vst [vmem:[%s205_s6] sm:$0xff] %v362_v38  ;;  %404 = vst [vmem:[%s205_s6 + $0x20] sm:$0xff] %v382_v39  ;;  %v377_v43 = vadd.f32 %v570_v40, %v248_v27  ;;  %v397_v44 = vadd.f32 %v576_v41, %v268_v37 }
 0x105   : > { %v371_v45 = vpop.f32.mrf.mxu0  ;;  %v391_v46 = vpop.f32.mrf.mxu1 }
 0x106   : > { %403 = vst [vmem:[%s205_s6 + $0x18] sm:$0xff] %v377_v43  ;;  %407 = vst [vmem:[%s205_s6 + $0x38] sm:$0xff] %v397_v44  ;;  %v372_v47 = vadd.f32 %v371_v45, %v243_v25  ;;  %v392_v48 = vadd.f32 %v391_v46, %v263_v42 }
 0x108   : > { %402 = vst [vmem:[%s205_s6 + $0x10] sm:$0xff] %v372_v47  ;;  %406 = vst [vmem:[%s205_s6 + $0x30] sm:$0xff] %v392_v48 }
 0x109   : > { %703 = shalt.err (!%p700_p6)
}
 0x10a   : > { %s704_s22 = scalar_lea.hbm %s967_s10, 1024  ;;  %s708_s4 = scalar_lea.hbm %s1018_s3, 2048 }
 0x10b   : > { %p705_p7 = scmp.ne.s32.totalorder %s967_s10, %s704_s22  ;;  %p709_p13 = scmp.lt.s32.totalorder %s967_s10, %s1018_s3 }
 0x10c   : > { %p710_p2 = scmp.lt.s32.totalorder %s708_s4, %s704_s22 }
 0x10d   : > { %p706_p10 = pnand %p705_p7, %p850_p9 }
 0x10e   : > { %p711_p8 = por %p710_p2, %p709_p13 }
 0x10f   : > { %p707_p4 = pneg %p706_p10 }
 0x111   : > { %p712_p12 = pnand %p711_p8, %p707_p4 }
 0x113   : > { %715 = shalt.err (!%p712_p12)
}
 0x114   : > { %s777_s6 = smov 128   ;;  %s778_s8 = smov 8  }
 0x115   : > { %595 = dma.vmem_to_hbm [thread:$0]  (%p850_p9), %s962_s7, 1024, %s967_s10, %s409_s15, %s777_s6, %s777_s6, %s778_s8  }
 0x116 PF: > { %s438_s29 = sand.u32 1, %s750_s12   ;;  %p1024_p0 = scmp.ge.s32.totalorder %s770_s17, 2 }
 0x117   : > { %s439_s9 = scalar_lea.sflag [#allocation4], %s438_s29 }
 0x118   : > { %p602_p1 = pnand %p1024_p0, %p857_p11 }
 0x11a   : > { %p603_p3 = pneg %p602_p1 }
 0x11c   : > { %745 = dma.done.wait (%p603_p3), %s439_s9, 1024  }
 0x11d   : > { %747 = vsyncadd (%p603_p3), %s439_s9, 4294966272  ;;  %s19_s17 = sadd.s32 1, %s770_s17   ;;  %s1025_s12 = smov %s754_s13 }
 0x11e   : > { %p16_p5 = scmp.ge.s32.totalorder %s19_s17, 4   ;;  %s1026_s13 = smov %s758_s14 }
 0x11f   : > { %s1027_s14 = smov %s855_s26  ;;  %s1028_s15 = smov %s766_s16 }
 0x120   : > { %s1029_s16 = smov %s1031_s20  ;;  %18 = sbr.rel (!%p16_p5) target bundleno = 6 (0x6), region = 77 }
 0x125   :  { %444 = vsyncpa [#allocation3], 1 }
 0x126   :  { %446 = vsyncpa [#allocation3 + $0x1], 1 }
 0x127   :  { %447 = vsyncpa [#allocation4], 1 }
 0x128   :  { %449 = vsyncpa [#allocation4 + $0x1], 1 }

</bundles_post_ra>
